<compile_context>
chip_gen: v7x
topology: tpu7x:2x2x1
jax: 0.10.0
libtpu: 0.0.40
codegen_flags: <defaults>
</compile_context>

<pallas_src>
import math
from functools import partial

import jax
import jax.numpy as jnp
from jax import lax
from jax.experimental import pallas as pl
from jax.experimental.pallas import tpu as pltpu


def _vmem_limit_bytes():
    # Leave headroom for Mosaic internal scratch / pipeline buffers; on v7x the
    # physical per-TC VMEM is only 64 MiB, so never ask for all of it.
    cap = 128 * 1024 * 1024
    try:
        info = pltpu.get_tpu_info()
        cap = int(getattr(info, "vmem_capacity_bytes", cap))
    except Exception:
        pass
    return min(cap - 16 * 1024 * 1024, 96 * 1024 * 1024)


def _pick_tile(S, cap=256):
    if S <= cap:
        return S
    for t in (cap, 128, 64, 32, 16, 8):
        if S % t == 0:
            return t
    return S


# ---------------------------------------------------------------------------
# Fused kernel: QKV projection + multi-head attention.  grid = (B, S // TQ)
#   (b parallel for megacore, query tiles "arbitrary" so the per-row K/V
#    scratch computed at qi == 0 stays valid for the row's remaining tiles)
# ---------------------------------------------------------------------------
def _fused_kernel(x_ref, w_ref, b_ref, mask_ref, o_ref, kv_ref,
                  *, num_heads, head_dim, hidden, tq):
    qi = pl.program_id(1)

    # K/V projection for the whole row, computed once per batch row and kept
    # resident in VMEM across all query tiles of that row.
    @pl.when(qi == 0)
    def _():
        x = x_ref[0].astype(jnp.bfloat16)                                   # (S, H)
        kv = jnp.dot(x, w_ref[:, hidden:],
                     preferred_element_type=jnp.float32)                    # (S, 2H) f32
        kv_ref[...] = (kv + b_ref[0, hidden:]).astype(jnp.bfloat16)

    # Q projection for this query tile.  1/sqrt(d) is pre-folded into the Q
    # columns of w/b, so no in-kernel scaling is needed.
    q_start = pl.multiple_of(qi * tq, tq)
    xq = x_ref[0, pl.ds(q_start, tq), :].astype(jnp.bfloat16)               # (TQ, H)
    q = (jnp.dot(xq, w_ref[:, :hidden], preferred_element_type=jnp.float32)
         + b_ref[0, :hidden]).astype(jnp.bfloat16)                          # (TQ, H)

    mask = mask_ref[0, 0].astype(jnp.float32)                               # (1, S) broadcast over rows

    for h in range(num_heads):          # static unroll; no concat at the end
        lo = h * head_dim
        q_h = q[:, lo:lo + head_dim]                                        # (TQ, d) bf16
        k_h = kv_ref[:, lo:lo + head_dim]                                   # (S, d)  bf16
        v_h = kv_ref[:, hidden + lo:hidden + lo + head_dim]                 # (S, d)  bf16
        # q @ k^T directly on the MXU (contract dim 1 of both) — no transpose.
        scores = lax.dot_general(q_h, k_h,
                                 dimension_numbers=(((1,), (1,)), ((), ())),
                                 preferred_element_type=jnp.float32)        # (TQ, S) f32
        scores = scores + mask
        # Softmax kept in f32 (v5e VPU/EUP have no bf16 path); EUP reciprocal.
        m = jnp.max(scores, axis=-1, keepdims=True)
        e = jnp.exp(scores - m)
        probs = e * pl.reciprocal(jnp.sum(e, axis=-1, keepdims=True), approx=True)
        # TODO(synk): nn.Dropout(attention_probs) is identity in eval mode.
        ctx = jnp.dot(probs.astype(jnp.bfloat16), v_h,
                      preferred_element_type=jnp.float32)                   # (TQ, d) f32
        # Direct per-head slice write: bounds live ranges, no jnp.concatenate.
        o_ref[0, :, lo:lo + head_dim] = ctx.astype(o_ref.dtype)


def fused_self_attention(hidden_states, wqkv_t, bqkv, attention_mask,
                         num_heads, head_dim):
    B, S, H = hidden_states.shape
    H3 = wqkv_t.shape[1]
    tq = _pick_tile(S)
    kernel = partial(_fused_kernel, num_heads=num_heads, head_dim=head_dim,
                     hidden=H, tq=tq)
    return pl.pallas_call(
        kernel,
        out_shape=jax.ShapeDtypeStruct((B, S, H), hidden_states.dtype),
        grid_spec=pltpu.PrefetchScalarGridSpec(
            num_scalar_prefetch=0,
            grid=(B, S // tq),
            in_specs=[
                # Full row of activations; constant block index across query
                # tiles -> DMA'd once per batch row, stays resident.
                pl.BlockSpec((1, S, H), lambda b, q: (b, 0, 0)),
                # Fused bf16 Q|K|V weight and f32 bias, resident across grid.
                pl.BlockSpec((H, H3), lambda b, q: (0, 0)),
                pl.BlockSpec((1, H3), lambda b, q: (0, 0)),
                pl.BlockSpec((1, 1, 1, S), lambda b, q: (b, 0, 0, 0)),
            ],
            out_specs=pl.BlockSpec((1, tq, H), lambda b, q: (b, q, 0)),
            scratch_shapes=[pltpu.VMEM((S, 2 * H), jnp.bfloat16)],   # per-row K|V
        ),
        compiler_params=pltpu.CompilerParams(
            dimension_semantics=("parallel", "arbitrary"),
            vmem_limit_bytes=_vmem_limit_bytes()),
    )(hidden_states, wqkv_t, bqkv, attention_mask)


# ---------------------------------------------------------------------------
# BertSelfAttention forward (absolute positions, self-attention branch).
# ---------------------------------------------------------------------------
def bert_self_attention(hidden_states, params, num_heads, attention_mask=None):
    B, S, H = hidden_states.shape
    d = H // num_heads
    if attention_mask is None:
        attention_mask = jnp.zeros((B, 1, 1, S), dtype=jnp.float32)
    ctx = fused_self_attention(hidden_states, params["wqkv_t"], params["bqkv"],
                               attention_mask, num_heads, d)
    # TODO(synk): relative_key(_query) position embeddings, cross-attention,
    # past_key_value cache, head_mask and output_attentions branches are not
    # exercised (config defaults).
    return (ctx,)


# ---------------------------------------------------------------------------
# Deterministic parameter init + pure-JAX reference + example run.
# ---------------------------------------------------------------------------
def init_params(key, hidden_size, num_heads):
    d = hidden_size // num_heads
    inv_sqrt_d = 1.0 / math.sqrt(d)
    ks = jax.random.split(key, 6)
    s = 0.02
    # nn.Linear weight is (out, in); kernel computes x @ W^T with Wq|Wk|Wv fused
    # along the output dim and stored in bf16 for the MXU.  The 1/sqrt(d)
    # attention scale is folded into the Q columns (weights AND bias).
    wq = s * jax.random.normal(ks[0], (hidden_size, hidden_size), jnp.float32)
    wk = s * jax.random.normal(ks[1], (hidden_size, hidden_size), jnp.float32)
    wv = s * jax.random.normal(ks[2], (hidden_size, hidden_size), jnp.float32)
    bq = s * jax.random.normal(ks[3], (hidden_size,), jnp.float32)
    bk = s * jax.random.normal(ks[4], (hidden_size,), jnp.float32)
    bv = s * jax.random.normal(ks[5], (hidden_size,), jnp.float32)
    wqkv_t = jnp.concatenate([wq.T * inv_sqrt_d, wk.T, wv.T], axis=1)       # (H, 3H)
    bqkv = jnp.concatenate([bq * inv_sqrt_d, bk, bv]).reshape(1, 3 * hidden_size)
    return {
        "wqkv_t": wqkv_t.astype(jnp.bfloat16),
        "bqkv": bqkv.astype(jnp.float32),
        # Unfolded f32 copies, used only by the pure-JAX PyTorch-style reference.
        "_ref": {"wq": wq, "wk": wk, "wv": wv, "bq": bq, "bk": bk, "bv": bv},
    }


def _reference(hidden_states, ref_p, num_heads, attention_mask):
    B, S, H = hidden_states.shape
    d = H // num_heads
    q = hidden_states @ ref_p["wq"].T + ref_p["bq"]
    k = hidden_states @ ref_p["wk"].T + ref_p["bk"]
    v = hidden_states @ ref_p["wv"].T + ref_p["bv"]
    sh = lambda t: t.reshape(B, S, num_heads, d).transpose(0, 2, 1, 3)
    q, k, v = sh(q), sh(k), sh(v)
    scores = jnp.einsum("bhqd,bhkd->bhqk", q, k) / math.sqrt(d)
    scores = scores + attention_mask
    probs = jax.nn.softmax(scores, axis=-1)
    ctx = jnp.einsum("bhqk,bhkd->bhqd", probs, v)
    return ctx.transpose(0, 2, 1, 3).reshape(B, S, H)


if __name__ == "__main__":
    # config: hidden_size=32, num_attention_heads=4, seq=8, batch=2
    # NOTE: tiny demo shapes pad to (8,128)/MXU minimums; tune at real BERT dims.
    B, S, H, nH = 2, 8, 32, 4

    key = jax.random.PRNGKey(0)
    k_x, k_p, k_m = jax.random.split(key, 3)

    hidden_states = jax.random.normal(k_x, (B, S, H), dtype=jnp.float32)
    params = init_params(k_p, H, nH)

    # HF-style additive attention mask: 0 for keep, -10000 for masked positions.
    keep = (jax.random.uniform(k_m, (B, 1, 1, S)) > 0.2).astype(jnp.float32)
    attention_mask = (1.0 - keep) * -10000.0

    (out,) = bert_self_attention(hidden_states, params, nH, attention_mask)
    out = jax.block_until_ready(out)

    ref = _reference(hidden_states, params["_ref"], nH, attention_mask)
    assert out.shape == (B, S, H)
    # bf16 MXU operands/K-V scratch + approx reciprocal -> looser tolerance than pure f32.
    assert jnp.allclose(out, ref, atol=1e-2, rtol=1e-2), float(jnp.max(jnp.abs(out - ref)))

    print("KERNEL_OK")
</pallas_src>

<mosaic_0001>
module attributes {stable_mosaic.version = 11 : i64} {
  func.func @_fused_kernel(%arg0: i32, %arg1: i32, %arg2: memref<1x8x32xf32, #tpu.memory_space<vmem>>, %arg3: memref<32x96xbf16, #tpu.memory_space<vmem>>, %arg4: memref<1x96xf32, #tpu.memory_space<vmem>>, %arg5: memref<1x1x1x8xf32, #tpu.memory_space<vmem>>, %arg6: memref<1x8x32xf32, #tpu.memory_space<vmem>>, %arg7: memref<8x64xbf16, #tpu.memory_space<vmem>>) attributes {dimension_semantics = [#tpu.dimension_semantics<parallel>, #tpu.dimension_semantics<arbitrary>], iteration_bounds = array<i64: 2, 1>, scalar_prefetch = 0 : i64, scratch_operands = 1 : i64, tpu.core_type = #tpu.core_type<tc>, window_params = [{transform_indices = @transform_0, window_bounds = array<i64: 1, 8, 32>}, {pipeline_mode = #tpu.pipeline_mode<synchronous>, transform_indices = @transform_1, window_bounds = array<i64: 32, 96>}, {pipeline_mode = #tpu.pipeline_mode<synchronous>, transform_indices = @transform_2, window_bounds = array<i64: 1, 96>}, {transform_indices = @transform_3, window_bounds = array<i64: 1, 1, 1, 8>}, {transform_indices = @transform_4, window_bounds = array<i64: 1, 8, 32>}]} {
    %c0_i32 = arith.constant 0 : i32
    %0 = arith.cmpi eq, %arg1, %c0_i32 : i32
    %1 = arith.extui %0 : i1 to i32
    %c0_i32_0 = arith.constant 0 : i32
    %2 = arith.cmpi ne, %1, %c0_i32_0 : i32
    scf.if %2 {
      %c0_47 = arith.constant 0 : index
      %c0_48 = arith.constant 0 : index
      %c0_49 = arith.constant 0 : index
      %103 = vector.load %arg2[%c0_47, %c0_48, %c0_49] : memref<1x8x32xf32, #tpu.memory_space<vmem>>, vector<1x8x32xf32>
      %104 = vector.shape_cast %103 : vector<1x8x32xf32> to vector<8x32xf32>
      %105 = arith.truncf %104 : vector<8x32xf32> to vector<8x32xbf16>
      %c0_50 = arith.constant 0 : index
      %c32_51 = arith.constant 32 : index
      %106 = vector.load %arg3[%c0_50, %c32_51] : memref<32x96xbf16, #tpu.memory_space<vmem>>, vector<32x64xbf16>
      %cst_52 = arith.constant dense<0.000000e+00> : vector<8x64xf32>
      %107 = tpu.matmul %105, %106, %cst_52 {dimension_numbers = #tpu.dot_dimension_numbers<[1], [0], [0], [1], [0, 0, 1, 1], [], []>} : vector<8x32xbf16>, vector<32x64xbf16>, vector<8x64xf32> -> vector<8x64xf32>
      %c0_53 = arith.constant 0 : index
      %c32_54 = arith.constant 32 : index
      %108 = vector.load %arg4[%c0_53, %c32_54] : memref<1x96xf32, #tpu.memory_space<vmem>>, vector<1x64xf32>
      %109 = vector.shape_cast %108 : vector<1x64xf32> to vector<64xf32>
      %110 = vector.shape_cast %109 : vector<64xf32> to vector<1x64xf32>
      %111 = vector.broadcast %110 : vector<1x64xf32> to vector<8x64xf32>
      %112 = arith.addf %107, %111 : vector<8x64xf32>
      %113 = arith.truncf %112 : vector<8x64xf32> to vector<8x64xbf16>
      %c0_55 = arith.constant 0 : index
      %c0_56 = arith.constant 0 : index
      %114 = vector.load %arg7[%c0_55, %c0_56] : memref<8x64xbf16, #tpu.memory_space<vmem>>, vector<8x64xbf16>
      tpu.vector_store %arg7[%c0_55, %c0_56], %113 {strides = array<i32>} : memref<8x64xbf16, #tpu.memory_space<vmem>>, vector<8x64xbf16>,
    } else {
    }
    %c8_i32 = arith.constant 8 : i32
    %3 = arith.muli %arg1, %c8_i32 : i32
    %4 = tpu.assume_multiple %3, 8 : i32
    %c0 = arith.constant 0 : index
    %5 = arith.index_cast %4 : i32 to index
    %c0_1 = arith.constant 0 : index
    %6 = vector.load %arg2[%c0, %5, %c0_1] : memref<1x8x32xf32, #tpu.memory_space<vmem>>, vector<1x8x32xf32>
    %7 = vector.shape_cast %6 : vector<1x8x32xf32> to vector<8x32xf32>
    %8 = arith.truncf %7 : vector<8x32xf32> to vector<8x32xbf16>
    %c0_2 = arith.constant 0 : index
    %c0_3 = arith.constant 0 : index
    %9 = vector.load %arg3[%c0_2, %c0_3] : memref<32x96xbf16, #tpu.memory_space<vmem>>, vector<32x32xbf16>
    %cst = arith.constant dense<0.000000e+00> : vector<8x32xf32>
    %10 = tpu.matmul %8, %9, %cst {dimension_numbers = #tpu.dot_dimension_numbers<[1], [0], [0], [1], [0, 0, 1, 1], [], []>} : vector<8x32xbf16>, vector<32x32xbf16>, vector<8x32xf32> -> vector<8x32xf32>
    %c0_4 = arith.constant 0 : index
    %c0_5 = arith.constant 0 : index
    %11 = vector.load %arg4[%c0_4, %c0_5] : memref<1x96xf32, #tpu.memory_space<vmem>>, vector<1x32xf32>
    %12 = vector.shape_cast %11 : vector<1x32xf32> to vector<32xf32>
    %13 = vector.shape_cast %12 : vector<32xf32> to vector<1x32xf32>
    %14 = vector.broadcast %13 : vector<1x32xf32> to vector<8x32xf32>
    %15 = arith.addf %10, %14 : vector<8x32xf32>
    %16 = arith.truncf %15 : vector<8x32xf32> to vector<8x32xbf16>
    %c0_6 = arith.constant 0 : index
    %c0_7 = arith.constant 0 : index
    %c0_8 = arith.constant 0 : index
    %c0_9 = arith.constant 0 : index
    %17 = vector.load %arg5[%c0_6, %c0_7, %c0_8, %c0_9] : memref<1x1x1x8xf32, #tpu.memory_space<vmem>>, vector<1x1x1x8xf32>
    %18 = vector.shape_cast %17 : vector<1x1x1x8xf32> to vector<1x8xf32>
    %19 = vector.extract_strided_slice %16 {offsets = [0, 0], sizes = [8, 8], strides = [1, 1]} : vector<8x32xbf16> to vector<8x8xbf16>
    %c0_10 = arith.constant 0 : index
    %c0_11 = arith.constant 0 : index
    %20 = vector.load %arg7[%c0_10, %c0_11] : memref<8x64xbf16, #tpu.memory_space<vmem>>, vector<8x8xbf16>
    %c0_12 = arith.constant 0 : index
    %c32 = arith.constant 32 : index
    %21 = vector.load %arg7[%c0_12, %c32] : memref<8x64xbf16, #tpu.memory_space<vmem>>, vector<8x8xbf16>
    %cst_13 = arith.constant dense<0.000000e+00> : vector<8x8xf32>
    %22 = tpu.matmul %19, %20, %cst_13 {dimension_numbers = #tpu.dot_dimension_numbers<[1], [1], [0], [0], [0, 0, 1, 0], [], []>} : vector<8x8xbf16>, vector<8x8xbf16>, vector<8x8xf32> -> vector<8x8xf32>
    %23 = vector.broadcast %18 : vector<1x8xf32> to vector<8x8xf32>
    %24 = arith.addf %22, %23 : vector<8x8xf32>
    %cst_14 = arith.constant dense<0xFF800000> : vector<8xf32>
    %25 = vector.multi_reduction <maximumf>, %24, %cst_14 [1] : vector<8x8xf32> to vector<8xf32>
    %26 = vector.shape_cast %25 : vector<8xf32> to vector<8x1xf32>
    %27 = vector.broadcast %26 : vector<8x1xf32> to vector<8x8xf32>
    %28 = arith.subf %24, %27 : vector<8x8xf32>
    %29 = math.exp %28 : vector<8x8xf32>
    %cst_15 = arith.constant dense<0.000000e+00> : vector<8xf32>
    %30 = vector.multi_reduction <add>, %29, %cst_15 [1] : vector<8x8xf32> to vector<8xf32>
    %31 = vector.shape_cast %30 : vector<8xf32> to vector<8x1xf32>
    %32 = tpu.reciprocal %31 {approx = true} : vector<8x1xf32> -> vector<8x1xf32>
    %33 = vector.broadcast %32 : vector<8x1xf32> to vector<8x8xf32>
    %34 = arith.mulf %29, %33 : vector<8x8xf32>
    %35 = arith.truncf %34 : vector<8x8xf32> to vector<8x8xbf16>
    %cst_16 = arith.constant dense<0.000000e+00> : vector<8x8xf32>
    %36 = tpu.matmul %35, %21, %cst_16 {dimension_numbers = #tpu.dot_dimension_numbers<[1], [0], [0], [1], [0, 0, 1, 1], [], []>} : vector<8x8xbf16>, vector<8x8xbf16>, vector<8x8xf32> -> vector<8x8xf32>
    %c0_17 = arith.constant 0 : index
    %c0_18 = arith.constant 0 : index
    %c0_19 = arith.constant 0 : index
    %37 = vector.load %arg6[%c0_17, %c0_18, %c0_19] : memref<1x8x32xf32, #tpu.memory_space<vmem>>, vector<1x8x8xf32>
    %38 = vector.shape_cast %37 : vector<1x8x8xf32> to vector<8x8xf32>
    %39 = vector.shape_cast %36 : vector<8x8xf32> to vector<1x8x8xf32>
    tpu.vector_store %arg6[%c0_17, %c0_18, %c0_19], %39 {strides = array<i32>} : memref<1x8x32xf32, #tpu.memory_space<vmem>>, vector<1x8x8xf32>,
    %40 = vector.extract_strided_slice %16 {offsets = [0, 8], sizes = [8, 8], strides = [1, 1]} : vector<8x32xbf16> to vector<8x8xbf16>
    %c0_20 = arith.constant 0 : index
    %c8 = arith.constant 8 : index
    %41 = vector.load %arg7[%c0_20, %c8] : memref<8x64xbf16, #tpu.memory_space<vmem>>, vector<8x8xbf16>
    %c0_21 = arith.constant 0 : index
    %c40 = arith.constant 40 : index
    %42 = vector.load %arg7[%c0_21, %c40] : memref<8x64xbf16, #tpu.memory_space<vmem>>, vector<8x8xbf16>
    %cst_22 = arith.constant dense<0.000000e+00> : vector<8x8xf32>
    %43 = tpu.matmul %40, %41, %cst_22 {dimension_numbers = #tpu.dot_dimension_numbers<[1], [1], [0], [0], [0, 0, 1, 0], [], []>} : vector<8x8xbf16>, vector<8x8xbf16>, vector<8x8xf32> -> vector<8x8xf32>
    %44 = vector.broadcast %18 : vector<1x8xf32> to vector<8x8xf32>
    %45 = arith.addf %43, %44 : vector<8x8xf32>
    %cst_23 = arith.constant dense<0xFF800000> : vector<8xf32>
    %46 = vector.multi_reduction <maximumf>, %45, %cst_23 [1] : vector<8x8xf32> to vector<8xf32>
    %47 = vector.shape_cast %46 : vector<8xf32> to vector<8x1xf32>
    %48 = vector.broadcast %47 : vector<8x1xf32> to vector<8x8xf32>
    %49 = arith.subf %45, %48 : vector<8x8xf32>
    %50 = math.exp %49 : vector<8x8xf32>
    %cst_24 = arith.constant dense<0.000000e+00> : vector<8xf32>
    %51 = vector.multi_reduction <add>, %50, %cst_24 [1] : vector<8x8xf32> to vector<8xf32>
    %52 = vector.shape_cast %51 : vector<8xf32> to vector<8x1xf32>
    %53 = tpu.reciprocal %52 {approx = true} : vector<8x1xf32> -> vector<8x1xf32>
    %54 = vector.broadcast %53 : vector<8x1xf32> to vector<8x8xf32>
    %55 = arith.mulf %50, %54 : vector<8x8xf32>
    %56 = arith.truncf %55 : vector<8x8xf32> to vector<8x8xbf16>
    %cst_25 = arith.constant dense<0.000000e+00> : vector<8x8xf32>
    %57 = tpu.matmul %56, %42, %cst_25 {dimension_numbers = #tpu.dot_dimension_numbers<[1], [0], [0], [1], [0, 0, 1, 1], [], []>} : vector<8x8xbf16>, vector<8x8xbf16>, vector<8x8xf32> -> vector<8x8xf32>
    %c0_26 = arith.constant 0 : index
    %c0_27 = arith.constant 0 : index
    %c8_28 = arith.constant 8 : index
    %58 = vector.load %arg6[%c0_26, %c0_27, %c8_28] : memref<1x8x32xf32, #tpu.memory_space<vmem>>, vector<1x8x8xf32>
    %59 = vector.shape_cast %58 : vector<1x8x8xf32> to vector<8x8xf32>
    %60 = vector.shape_cast %57 : vector<8x8xf32> to vector<1x8x8xf32>
    tpu.vector_store %arg6[%c0_26, %c0_27, %c8_28], %60 {strides = array<i32>} : memref<1x8x32xf32, #tpu.memory_space<vmem>>, vector<1x8x8xf32>,
    %61 = vector.extract_strided_slice %16 {offsets = [0, 16], sizes = [8, 8], strides = [1, 1]} : vector<8x32xbf16> to vector<8x8xbf16>
    %c0_29 = arith.constant 0 : index
    %c16 = arith.constant 16 : index
    %62 = vector.load %arg7[%c0_29, %c16] : memref<8x64xbf16, #tpu.memory_space<vmem>>, vector<8x8xbf16>
    %c0_30 = arith.constant 0 : index
    %c48 = arith.constant 48 : index
    %63 = vector.load %arg7[%c0_30, %c48] : memref<8x64xbf16, #tpu.memory_space<vmem>>, vector<8x8xbf16>
    %cst_31 = arith.constant dense<0.000000e+00> : vector<8x8xf32>
    %64 = tpu.matmul %61, %62, %cst_31 {dimension_numbers = #tpu.dot_dimension_numbers<[1], [1], [0], [0], [0, 0, 1, 0], [], []>} : vector<8x8xbf16>, vector<8x8xbf16>, vector<8x8xf32> -> vector<8x8xf32>
    %65 = vector.broadcast %18 : vector<1x8xf32> to vector<8x8xf32>
    %66 = arith.addf %64, %65 : vector<8x8xf32>
    %cst_32 = arith.constant dense<0xFF800000> : vector<8xf32>
    %67 = vector.multi_reduction <maximumf>, %66, %cst_32 [1] : vector<8x8xf32> to vector<8xf32>
    %68 = vector.shape_cast %67 : vector<8xf32> to vector<8x1xf32>
    %69 = vector.broadcast %68 : vector<8x1xf32> to vector<8x8xf32>
    %70 = arith.subf %66, %69 : vector<8x8xf32>
    %71 = math.exp %70 : vector<8x8xf32>
    %cst_33 = arith.constant dense<0.000000e+00> : vector<8xf32>
    %72 = vector.multi_reduction <add>, %71, %cst_33 [1] : vector<8x8xf32> to vector<8xf32>
    %73 = vector.shape_cast %72 : vector<8xf32> to vector<8x1xf32>
    %74 = tpu.reciprocal %73 {approx = true} : vector<8x1xf32> -> vector<8x1xf32>
    %75 = vector.broadcast %74 : vector<8x1xf32> to vector<8x8xf32>
    %76 = arith.mulf %71, %75 : vector<8x8xf32>
    %77 = arith.truncf %76 : vector<8x8xf32> to vector<8x8xbf16>
    %cst_34 = arith.constant dense<0.000000e+00> : vector<8x8xf32>
    %78 = tpu.matmul %77, %63, %cst_34 {dimension_numbers = #tpu.dot_dimension_numbers<[1], [0], [0], [1], [0, 0, 1, 1], [], []>} : vector<8x8xbf16>, vector<8x8xbf16>, vector<8x8xf32> -> vector<8x8xf32>
    %c0_35 = arith.constant 0 : index
    %c0_36 = arith.constant 0 : index
    %c16_37 = arith.constant 16 : index
    %79 = vector.load %arg6[%c0_35, %c0_36, %c16_37] : memref<1x8x32xf32, #tpu.memory_space<vmem>>, vector<1x8x8xf32>
    %80 = vector.shape_cast %79 : vector<1x8x8xf32> to vector<8x8xf32>
    %81 = vector.shape_cast %78 : vector<8x8xf32> to vector<1x8x8xf32>
    tpu.vector_store %arg6[%c0_35, %c0_36, %c16_37], %81 {strides = array<i32>} : memref<1x8x32xf32, #tpu.memory_space<vmem>>, vector<1x8x8xf32>,
    %82 = vector.extract_strided_slice %16 {offsets = [0, 24], sizes = [8, 8], strides = [1, 1]} : vector<8x32xbf16> to vector<8x8xbf16>
    %c0_38 = arith.constant 0 : index
    %c24 = arith.constant 24 : index
    %83 = vector.load %arg7[%c0_38, %c24] : memref<8x64xbf16, #tpu.memory_space<vmem>>, vector<8x8xbf16>
    %c0_39 = arith.constant 0 : index
    %c56 = arith.constant 56 : index
    %84 = vector.load %arg7[%c0_39, %c56] : memref<8x64xbf16, #tpu.memory_space<vmem>>, vector<8x8xbf16>
    %cst_40 = arith.constant dense<0.000000e+00> : vector<8x8xf32>
    %85 = tpu.matmul %82, %83, %cst_40 {dimension_numbers = #tpu.dot_dimension_numbers<[1], [1], [0], [0], [0, 0, 1, 0], [], []>} : vector<8x8xbf16>, vector<8x8xbf16>, vector<8x8xf32> -> vector<8x8xf32>
    %86 = vector.broadcast %18 : vector<1x8xf32> to vector<8x8xf32>
    %87 = arith.addf %85, %86 : vector<8x8xf32>
    %cst_41 = arith.constant dense<0xFF800000> : vector<8xf32>
    %88 = vector.multi_reduction <maximumf>, %87, %cst_41 [1] : vector<8x8xf32> to vector<8xf32>
    %89 = vector.shape_cast %88 : vector<8xf32> to vector<8x1xf32>
    %90 = vector.broadcast %89 : vector<8x1xf32> to vector<8x8xf32>
    %91 = arith.subf %87, %90 : vector<8x8xf32>
    %92 = math.exp %91 : vector<8x8xf32>
    %cst_42 = arith.constant dense<0.000000e+00> : vector<8xf32>
    %93 = vector.multi_reduction <add>, %92, %cst_42 [1] : vector<8x8xf32> to vector<8xf32>
    %94 = vector.shape_cast %93 : vector<8xf32> to vector<8x1xf32>
    %95 = tpu.reciprocal %94 {approx = true} : vector<8x1xf32> -> vector<8x1xf32>
    %96 = vector.broadcast %95 : vector<8x1xf32> to vector<8x8xf32>
    %97 = arith.mulf %92, %96 : vector<8x8xf32>
    %98 = arith.truncf %97 : vector<8x8xf32> to vector<8x8xbf16>
    %cst_43 = arith.constant dense<0.000000e+00> : vector<8x8xf32>
    %99 = tpu.matmul %98, %84, %cst_43 {dimension_numbers = #tpu.dot_dimension_numbers<[1], [0], [0], [1], [0, 0, 1, 1], [], []>} : vector<8x8xbf16>, vector<8x8xbf16>, vector<8x8xf32> -> vector<8x8xf32>
    %c0_44 = arith.constant 0 : index
    %c0_45 = arith.constant 0 : index
    %c24_46 = arith.constant 24 : index
    %100 = vector.load %arg6[%c0_44, %c0_45, %c24_46] : memref<1x8x32xf32, #tpu.memory_space<vmem>>, vector<1x8x8xf32>
    %101 = vector.shape_cast %100 : vector<1x8x8xf32> to vector<8x8xf32>
    %102 = vector.shape_cast %99 : vector<8x8xf32> to vector<1x8x8xf32>
    tpu.vector_store %arg6[%c0_44, %c0_45, %c24_46], %102 {strides = array<i32>} : memref<1x8x32xf32, #tpu.memory_space<vmem>>, vector<1x8x8xf32>,
    return
  }
  func.func @transform_0(%arg0: i32, %arg1: i32) -> (i32, i32, i32) {
    %c0_i32 = arith.constant 0 : i32
    %c0_i32_0 = arith.constant 0 : i32
    %c0_i32_1 = arith.constant 0 : i32
    return %arg0, %c0_i32, %c0_i32_0 : i32, i32, i32
  }
  func.func @transform_1(%arg0: i32, %arg1: i32) -> (i32, i32) {
    %c0_i32 = arith.constant 0 : i32
    %c0_i32_0 = arith.constant 0 : i32
    %c0_i32_1 = arith.constant 0 : i32
    return %c0_i32, %c0_i32_0 : i32, i32
  }
  func.func @transform_2(%arg0: i32, %arg1: i32) -> (i32, i32) {
    %c0_i32 = arith.constant 0 : i32
    %c0_i32_0 = arith.constant 0 : i32
    %c0_i32_1 = arith.constant 0 : i32
    return %c0_i32, %c0_i32_0 : i32, i32
  }
  func.func @transform_3(%arg0: i32, %arg1: i32) -> (i32, i32, i32, i32) {
    %c0_i32 = arith.constant 0 : i32
    %c0_i32_0 = arith.constant 0 : i32
    %c0_i32_1 = arith.constant 0 : i32
    %c0_i32_2 = arith.constant 0 : i32
    return %arg0, %c0_i32, %c0_i32_0, %c0_i32_1 : i32, i32, i32, i32
  }
  func.func @transform_4(%arg0: i32, %arg1: i32) -> (i32, i32, i32) {
    %c0_i32 = arith.constant 0 : i32
    %c0_i32_0 = arith.constant 0 : i32
    return %arg0, %arg1, %c0_i32 : i32, i32, i32
  }
}

</mosaic_0001>

<bundles_post_ra>
// kernel: tpu_custom_call.1
= control target key start
LH: loop header
LB: loop body
LE: loop exit
PB: predicated region body
PF: predicated region fallthrough
CT: control target
= control target key end

     0   :  { %9 = vsyncpa [#allocation4], 0  ;;  %s1941_s0 = inlined_call_operand.hbm [shape: f32[2,8,32], index: 0, kind: input, shape index: {}]   ;;  %s1942_s1 = inlined_call_operand.hbm [shape: bf16[32,96], index: 1, kind: input, shape index: {}]   ;;  %s1943_s2 = inlined_call_operand.hbm [shape: f32[1,96], index: 2, kind: input, shape index: {}]   ;;  %s1944_s3 = inlined_call_operand.hbm [shape: f32[2,1,1,8], index: 3, kind: input, shape index: {}]   ;;  %s1945_s4 = inlined_call_operand.hbm [shape: f32[2,8,32], index: 4, kind: output, shape index: {}]  }
   0x1   :  { %11 = vsyncpa [#allocation4 + $0x1], 0 }
   0x2   :  { %12 = vsyncpa [#allocation7], 0 }
   0x3   :  { %13 = vsyncpa [#allocation10], 0 }
   0x4   :  { %15 = vsyncpa [#allocation10 + $0x1], 0 }
   0x5   :  { %16 = vsyncpa [#allocation5], 0 }
   0x6   :  { %18 = vsyncpa [#allocation5 + $0x1], 0  ;;  %s1562_s15 = smov 0   ;;  %s1564_s16 = smov 0  }
   0x7   :  { %s1566_s17 = smov 0   ;;  %s1568_s18 = smov 0  }
   0x8   :  { %s1570_s19 = smov 0   ;;  %s1572_s20 = smov 0  }
   0x9 LB: > { %s1059_s21 = sadd.s32 4294967295, %s1516_s20   ;;  %s1060_s22 = sadd.s32 4294967294, %s1516_s20   ;;  %s1516_s20 = sphi %s1572_s20, %s24_s20   ;;  %s1512_s19 = sphi %s1570_s19, %s1969_s19   ;;  %s1508_s18 = sphi %s1568_s18, %s1968_s18   ;;  %s1504_s17 = sphi %s1566_s17, %s1967_s17   ;;  %s1500_s16 = sphi %s1564_s16, %s1966_s16   ;;  %s1496_s15 = sphi %s1562_s15, %s1965_s15  }
   0xa   : > { %p56_p0 = scmp.ne.s32.totalorder %s1500_s16, %s1496_s15  ;;  %p1596_p1 = scmp.eq.s32.totalorder %s1059_s21, 0 }
   0xb   : > { %p1600_p2 = scmp.eq.s32.totalorder %s1059_s21, 1  ;;  %p156_p3 = scmp.eq.s32.totalorder %s1060_s22, 1 }
   0xc   : > { %s1951_s23 = scalar_select %p1596_p1, 1, 0 }
   0xd   : > { %p1606_p4 = por %p1596_p1, %p56_p0  ;;  %p1061_p5 = scmp.ge.s32.totalorder %s1516_s20, 1 }
   0xe   : > { %p1611_p6 = por %p156_p3, %p56_p0  ;;  %p163_p7 = scmp.lt.s32.totalorder %s1516_s20, 3 }
   0xf   : > { %s1953_s25 = scalar_select %p1606_p4, 1, 0 }
  0x10   : > { %s1954_s26 = scalar_select %p1611_p6, 1, 0 }
  0x11   : > { %p1616_p8 = pnand %p1061_p5, %p163_p7  ;;  %s1518_s28 = smov [#allocation6]  }
  0x12   : > { %s175_s29 = sshll.u32 %s1518_s28, 4  ;;  %s1519_s5 = smov [#allocation8]   ;;  %s1620_s29 = int_to_ptr.vmem [resolvable:$true] %s175_s29 }
  0x13   : > { %s1955_s27 = scalar_select %p1616_p8, 1, 0 }
  0x14   : > { %p1198_p9 = pneg %p1616_p8  ;;  %s189_s6 = sshll.u32 %s1519_s5, 4  ;;  %s1631_s6 = int_to_ptr.vmem [resolvable:$true] %s189_s6 }
  0x15   : > { %s1310_s9 = scalar_lea.hbm %s1942_s1, 256 }
  0x16   : > { %p1627_p11 = pnand %p1198_p9, %p1596_p1  ;;  %p1311_p12 = scmp.ne.s32.totalorder %s1942_s1, %s1310_s9 }
  0x17   : > { %p1317_p5 = scmp.lt.u32.totalorder %s1310_s9, %s1942_s1 }
  0x18   : > { %p1312_p13 = pneg %p1627_p11 }
  0x1a   : > { %p1313_p0 = pnand %p1312_p13, %p1311_p12 }
  0x1c   : > { %p1314_p3 = pneg %p1313_p0 }
  0x1e   : > { %p1319_p7 = pnand %p1317_p5, %p1314_p3 }
  0x20   : > { %1322 = shalt.err (!%p1319_p7)
}
  0x21   : > { %s1323_s14 = scalar_lea.vmem %s1620_s29, 256  ;;  %p1331_p1 = scmp.lt.s32.totalorder %s1620_s29, %s1620_s29 }
  0x22   : > { %p1324_p9 = scmp.ne.s32.totalorder %s1620_s29, %s1323_s14  ;;  %p1332_p12 = scmp.lt.s32.totalorder %s1323_s14, %s1323_s14 }
  0x24   : > { %p1326_p10 = pnand %p1324_p9, %p1312_p13  ;;  %p1333_p0 = por %p1332_p12, %p1331_p1 }
  0x26   : > { %p1327_p6 = pneg %p1326_p10 }
  0x28   : > { %p1334_p4 = pnand %p1333_p0, %p1327_p6 }
  0x2a   : > { %1337 = shalt.err (!%p1334_p4)
}
  0x2b   : > { %s1520_s21 = smov 64   ;;  %s1521_s22 = smov 4  }
  0x2c   : > { %1201 = dma.hbm_to_vmem [thread:$0]  (!%p1627_p11), %s1942_s1, 256, %s1620_s29, [#allocation7], %s1520_s21, %s1520_s21, %s1521_s22  }
  0x2d   : > { %s1338_s9 = scalar_lea.hbm %s1943_s2, 16 }
  0x2e   : > { %p1339_p1 = scmp.ne.s32.totalorder %s1943_s2, %s1338_s9  ;;  %p1345_p10 = scmp.lt.u32.totalorder %s1338_s9, %s1943_s2 }
  0x30   : > { %p1341_p4 = pnand %p1339_p1, %p1312_p13 }
  0x32   : > { %p1342_p6 = pneg %p1341_p4 }
  0x34   : > { %p1347_p3 = pnand %p1345_p10, %p1342_p6 }
  0x36   : > { %1350 = shalt.err (!%p1347_p3)
}
  0x37   : > { %s1351_s29 = scalar_lea.vmem %s1631_s6, 16  ;;  %s1358_s14 = scalar_lea.vmem %s1631_s6, 32 }
  0x38   : > { %p1352_p5 = scmp.ne.s32.totalorder %s1631_s6, %s1351_s29  ;;  %p1359_p12 = scmp.lt.s32.totalorder %s1631_s6, %s1631_s6 }
  0x39   : > { %p1360_p0 = scmp.lt.s32.totalorder %s1358_s14, %s1351_s29 }
  0x3a   : > { %p1354_p7 = pnand %p1352_p5, %p1312_p13 }
  0x3b   : > { %p1361_p1 = por %p1360_p0, %p1359_p12 }
  0x3c   : > { %p1355_p9 = pneg %p1354_p7 }
  0x3e   : > { %p1362_p4 = pnand %p1361_p1, %p1355_p9 }
  0x40   : > { %1365 = shalt.err (!%p1362_p4)
}
  0x41   : > { %1204 = dma.hbm_to_vmem [thread:$0]  (!%p1627_p11), %s1943_s2, 16, %s1631_s6, [#allocation7]  }
  0x42   : > { %s36_s28 = sadd.s32 1, %s1512_s19  ;;  %s43_s5 = sadd.s32 1, %s1504_s17 }
  0x43   : > { %p38_p13 = scmp.ge.s32.totalorder %s36_s28, 2  ;;  %p50_p6 = scmp.ne.s32.totalorder %s1504_s17, %s1500_s16 }
  0x44   : > { %p51_p10 = scmp.eq.s32.totalorder %s1516_s20, 0  ;;  %p1218_p3 = scmp.lt.s32.totalorder %s1516_s20, 2 }
  0x45   : > { %s1971_s28 = smov (%p38_p13, %s36_s28), 0  ;;  %p1696_p7 = por %p1600_p2, %p50_p6 }
  0x46   : > { %p52_p5 = por %p51_p10, %p50_p6  ;;  %s40_s7 = ssub.s32 %s1512_s19, %s1971_s28 }
  0x47   : > { %s1957_s30 = scalar_select %p1696_p7, 1, 0 }
  0x48   : > { %s1703_s8 = sand.u32 1, %s1504_s17   ;;  %p41_p11 = scmp.eq.s32.totalorder %s40_s7, 0 }
  0x49   : > { %s1065_s6 = sshll.u32 %s1703_s8, 3  ;;  %s1066_s9 = sshll.u32 %s1512_s19, 7 }
  0x4a   : > { %s1708_s10 = scalar_select %p41_p11, %s1504_s17, %s43_s5  }
  0x4b   : > { %s1713_s13 = scalar_lea.hbm %s1941_s0, %s1066_s9  ;;  %s204_s24 = scalar_lea.vmem [#allocation3], %s1065_s6 }
  0x4c   : > { %s211_s29 = sshll.u32 %s204_s24, 4  ;;  %p1717_p2 = pnand %p1218_p3, %p52_p5  ;;  %s1721_s29 = int_to_ptr.vmem [resolvable:$true] %s211_s29 }
  0x4d   : > { %s201_s21 = scalar_lea.sflag [#allocation4], %s1703_s8  ;;  %s1366_s22 = scalar_lea.hbm %s1713_s13, 128 }
  0x4e   : > { %p1367_p9 = scmp.ne.s32.totalorder %s1713_s13, %s1366_s22  ;;  %p1368_p12 = pneg %p1717_p2 }
  0x4f   : > { %s1371_s6 = scalar_lea.hbm %s1941_s0, 256  ;;  %p1372_p4 = scmp.lt.u32.totalorder %s1713_s13, %s1941_s0 }
  0x50   : > { %p1369_p0 = pnand %p1368_p12, %p1367_p9  ;;  %p1373_p13 = scmp.lt.u32.totalorder %s1371_s6, %s1366_s22 }
  0x51   : > { %p1375_p10 = scmp.lt.u32.totalorder %s1366_s22, %s1713_s13 }
  0x52   : > { %p1370_p1 = pneg %p1369_p0  ;;  %p1374_p6 = por %p1373_p13, %p1372_p4 }
  0x54   : > { %p1376_p3 = por %p1375_p10, %p1374_p6 }
  0x56   : > { %p1377_p5 = pnand %p1376_p3, %p1370_p1 }
  0x58   : > { %1380 = shalt.err (!%p1377_p5)
}
  0x59   : > { %s1381_s12 = scalar_lea.vmem %s1721_s29, 128  ;;  %s1522_s24 = smov [#allocation3]  }
  0x5a   : > { %p1382_p11 = scmp.ne.s32.totalorder %s1721_s29, %s1381_s12  ;;  %s1386_s5 = sshll.u32 %s1522_s24, 4  ;;  %s1387_s5 = int_to_ptr.vmem [resolvable:$false] %s1386_s5 }
  0x5b   : > { %s1388_s7 = scalar_lea.vmem %s1387_s5, 256  ;;  %p1389_p7 = scmp.lt.s32.totalorder %s1721_s29, %s1387_s5 }
  0x5c   : > { %p1384_p9 = pnand %p1382_p11, %p1368_p12  ;;  %p1390_p4 = scmp.lt.s32.totalorder %s1388_s7, %s1381_s12 }
  0x5e   : > { %p1385_p0 = pneg %p1384_p9  ;;  %p1391_p13 = por %p1390_p4, %p1389_p7 }
  0x60   : > { %p1392_p6 = pnand %p1391_p13, %p1385_p0 }
  0x62   : > { %1395 = shalt.err (!%p1392_p6)
}
  0x63   : > { %1208 = dma.hbm_to_vmem [thread:$0]  (!%p1717_p2), %s1713_s13, 128, %s1721_s29, %s201_s21  }
  0x64   : > { %s1067_s22 = sshll.u32 %s1512_s19, 4  ;;  %s221_s6 = scalar_lea.vmem [#allocation9], %s1703_s8 }
  0x65   : > { %s228_s9 = sshll.u32 %s221_s6, 4  ;;  %s1754_s5 = scalar_lea.hbm %s1944_s3, %s1067_s22  ;;  %s229_s9 = int_to_ptr.vmem [resolvable:$true] %s228_s9 }
  0x66   : > { %s219_s12 = scalar_lea.sflag [#allocation10], %s1703_s8  ;;  %s1396_s7 = scalar_lea.hbm %s1754_s5, 16 }
  0x67   : > { %p1397_p7 = scmp.ne.s32.totalorder %s1754_s5, %s1396_s7  ;;  %s1401_s21 = scalar_lea.hbm %s1944_s3, 32 }
  0x68   : > { %p1402_p3 = scmp.lt.u32.totalorder %s1754_s5, %s1944_s3  ;;  %p1403_p5 = scmp.lt.u32.totalorder %s1401_s21, %s1396_s7 }
  0x69   : > { %p1399_p1 = pnand %p1397_p7, %p1368_p12  ;;  %p1405_p9 = scmp.lt.u32.totalorder %s1396_s7, %s1754_s5 }
  0x6a   : > { %p1404_p11 = por %p1403_p5, %p1402_p3 }
  0x6b   : > { %p1400_p10 = pneg %p1399_p1 }
  0x6c   : > { %p1406_p0 = por %p1405_p9, %p1404_p11 }
  0x6e   : > { %p1407_p4 = pnand %p1406_p0, %p1400_p10 }
  0x70   : > { %1410 = shalt.err (!%p1407_p4)
}
  0x71   : > { %s1411_s8 = scalar_lea.vmem %s229_s9, 16  ;;  %s1523_s22 = smov [#allocation9]  }
  0x72   : > { %p1412_p13 = scmp.ne.s32.totalorder %s229_s9, %s1411_s8  ;;  %s1416_s24 = sshll.u32 %s1523_s22, 4  ;;  %s1417_s24 = int_to_ptr.vmem [resolvable:$false] %s1416_s24 }
  0x73   : > { %s1418_s13 = scalar_lea.vmem %s1417_s24, 32  ;;  %p1419_p1 = scmp.lt.s32.totalorder %s229_s9, %s1417_s24 }
  0x74   : > { %p1414_p6 = pnand %p1412_p13, %p1368_p12  ;;  %p1420_p8 = scmp.lt.s32.totalorder %s1418_s13, %s1411_s8 }
  0x76   : > { %p1415_p7 = pneg %p1414_p6  ;;  %p1421_p3 = por %p1420_p8, %p1419_p1 }
  0x78   : > { %p1422_p5 = pnand %p1421_p3, %p1415_p7 }
  0x7a   : > { %1425 = shalt.err (!%p1422_p5)
}
  0x7b   : > { %1211 = dma.hbm_to_vmem [thread:$0]  (!%p1717_p2), %s1754_s5, 16, %s229_s9, %s219_s12  }
  0x7c   : > { %p1959_p10 = scmp.ne.s32.totalorder %s1955_s27, 0 }
  0x7d   : > { %s1779_s7 = sand.u32 (!%p1959_p10), 1, %s1500_s16   ;;  %p1960_p8 = scmp.ne.s32.totalorder (!%p1959_p10), %s1953_s25, 0 }
  0x7e   : > { %237 = sbr.rel (%p1959_p10) target bundleno = 1537 (0x601), region = 36  ;;  %s1069_s29 = sshll.u32 (!%p1959_p10), %s1779_s7, 3 }
  0x7f   : > { %s240_s21 = scalar_lea.sflag (!%p1959_p10), [#allocation4], %s1779_s7  ;;  %s243_s6 = scalar_lea.vmem (!%p1959_p10), [#allocation3], %s1069_s29 }
  0x85   : > { %1479 = dma.done.wait (%p1960_p8), %s240_s21, 128  }
  0x86   : > { %1481 = vsyncadd (%p1960_p8), %s240_s21, 4294967168  ;;  %p1961_p2 = scmp.ne.s32.totalorder %s1951_s23, 0 }
  0x88   : > { %1483 = dma.done.wait (%p1961_p2), [#allocation7], 272  }
  0x89   : > { %1485 = vsyncadd (%p1961_p2), [#allocation7], 4294967024  ;;  %s257_s27 = scalar_lea.sflag [#allocation10], %s1779_s7  ;;  %s259_s14 = scalar_lea.vmem [#allocation9], %s1779_s7 }
  0x8a   : > { %1487 = dma.done.wait (%p1960_p8), %s257_s27, 16  }
  0x8b   : > { %1489 = vsyncadd (%p1960_p8), %s257_s27, 4294967280  ;;  %v1524_v0 = vmov 0.0   ;;  %vm1525_vm0 = vmmov 0   ;;  %v1286_v1 = vld [vmem:[#allocation6] sm:$0xff]   ;;  %s1526_s23 = smov 96   ;;  %v1287_v2 = vld [vmem:[#allocation6 + $0x8] sm:$0xff]  }
  0x8c   : > { %1120 = vmatprep.subr.bf16.mxu0 %v1524_v0  ;;  %1124 = vmatprep.mubr.msk.bf16.mxu0 %vm1525_vm0, %v1524_v0  ;;  %v1288_v3 = vld [vmem:[#allocation6] sm:$0xff]   ;;  %v1073_v4 = vld [vmem:[#allocation8] ss:$0 sm:$0xff]  ;;  %v1289_v5 = vld [vmem:[#allocation6 + $0x8] sm:$0xff]   ;;  %vm324_vm1 = vcmask 261120   ;;  %s1527_s25 = smov 120  }
  0x8d   : > { %1128 = vmatprep.subr.bf16.mxu1 %v1524_v0  ;;  %1132 = vmatprep.mubr.msk.bf16.mxu1 %vm1525_vm0, %v1524_v0  ;;  %v293_v6 = vld [vmem:[%s243_s6] sm:$0xff]  ;;  %s1528_s9 = smov 112   ;;  %s1529_s5 = smov 104   ;;  %vm369_vm2 = vcmask 519168   ;;  %vm451_vm3 = vcmask 64512   ;;  %vm518_vm4 = vcmask 1043456  }
  0x8e   : > { %315 = vrot.lane.b32.xlu0 %v1286_v1, %s1526_s23  ;;  %1129 = vmatpush3.bf16.msra.mxu1 %v1288_v3  ;;  %v294_v7 = vpack.c.bf16 %v293_v6, %v293_v6  ;;  %v1081_v37 = vld [vmem:[%s259_s14] ss:$0 sm:$0xff]  ;;  %s1530_s12 = smov 88   ;;  %s1531_s11 = smov 72   ;;  %vm682_vm5 = vcmask 130112   ;;  %vm802_vm6 = vcmask 195712  }
  0x8f   : > { %321 = vrot.lane.b32.xlu1 %v1073_v4, %s1526_s23  ;;  %1130 = vmatprep.subr.bf16.mxu1 %v1524_v0  ;;  %s1532_s8 = smov 80   ;;  %s1880_s22 = scalar_lea.vmem [#allocation11], %s1069_s29  ;;  %vm922_vm7 = vcmask 261312  }
  0x90   : > { %s1533_s24 = smov 8   ;;  %s1534_s13 = smov 16  }
  0x91   : > { %s1535_s29 = smov 24   ;;  %s1095_s21 = sshll.u32 %s1508_s18, 7 }
  0x92   : > { %317 = vrot.lane.b32.xlu0 %v1287_v2, %s1526_s23  ;;  %1131 = vmatpush3.bf16.msra.mxu1 %v1289_v5  ;;  %s939_s6 = sshll.u32 %s1880_s22, 4  ;;  %p1962_p11 = scmp.ne.s32.totalorder %s1957_s30, 0  ;;  %s1893_s6 = int_to_ptr.vmem [resolvable:$true] %s939_s6 }
  0x93   : > { %1142 = vmatprep.subr.bf16.mxu1 %v1524_v0  ;;  %s1536_s18 = smov [#allocation11]  }
  0x95   : > { %1133 = vmatmul.mubr.msk.bf16.vlgmr.msra.gmra.mrb[0].mxu1 %vm324_vm1, %v294_v7 }
  0x96   : > { %1144 = vmatprep.mubr.msk.bf16.mxu1 %vm1525_vm0, %v1524_v0 }
 0x100   : > { %v316_v8 = vpop.permute.xlu0 %315 }
 0x101   : > { %1121 = vmatpush3.bf16.msra.mxu0 %v316_v8  ;;  %v322_v16 = vpop.permute.xlu1 %321 }
 0x102   : > { %1122 = vmatprep.subr.bf16.mxu0 %v1524_v0 }
 0x104   : > { %v318_v9 = vpop.permute.xlu0 %317 }
 0x105   : > { %1123 = vmatpush3.bf16.msra.mxu0 %v318_v9 }
 0x106   : > { %1136 = vmatprep.subr.bf16.mxu0 %v1524_v0 }
 0x108   : > { %1125 = vmatmul.mubr.msk.bf16.vlgmr.msra.gmra.mrb[0].mxu0 %vm324_vm1, %v294_v7 }
 0x109   : > { %1138 = vmatprep.mubr.msk.bf16.mxu0 %vm1525_vm0, %v1524_v0 }
 0x168   : > { %v436_v10 = vpop.f32.mrb[0].mxu1 }
 0x169   : > { %v437_v11 = vadd.f32 %v1073_v4, %v436_v10  ;;  %v1134_v12 = vpop.f32.mrb[1].mxu1 }
 0x16a   : > { %v439_v13 = vpop.f32.mrb[2].mxu1 }
 0x16b   : > { %v442_v14 = vpack.c.bf16 %v437_v11, %v437_v11  ;;  %v1135_v15 = vpop.f32.mrb[3].mxu1 }
 0x16d   : > { %565 = vrot.lane.b32.xlu0 %v442_v14, %s1527_s25 }
 0x171   : > { %685 = vrot.lane.b32.xlu0 %v442_v14, %s1528_s9 }
 0x175   : > { %805 = vrot.lane.b32.xlu0 %v442_v14, %s1529_s5 }
 0x1db   : > { %v362_v17 = vpop.f32.mrb[0].mxu0 }
 0x1dc   : > { %v363_v18 = vadd.f32 %v362_v17, %v322_v16  ;;  %v1126_v19 = vpop.f32.mrb[1].mxu0 }
 0x1dd   : > { %v365_v20 = vpop.f32.mrb[2].mxu0 }
 0x1de   : > { %v368_v21 = vpack.c.bf16 %v363_v18, %v363_v18  ;;  %v1127_v22 = vpop.f32.mrb[3].mxu0 }
 0x1df   : > { %v566_v31 = vpop.permute.xlu0 %565 }
 0x1e0   : > { %370 = vst.msk [vmem:[#allocation2] sm:$0xf] %vm369_vm2, %v368_v21 }
 0x1e3   : > { %v686_v34 = vpop.permute.xlu0 %685 }
 0x1e7   : > { %v1816_v23 = vld [vmem:[#allocation2] sm:$0xf]  ;;  %v806_v36 = vpop.permute.xlu0 %805 }
 0x1e8   : > { %v1818_v24 = vld [vmem:[#allocation2] ss:$0 sps:$4 sm:$0xff]   ;;  %v456_v25 = vsel %vm451_vm3, %v1816_v23, 0  ;;  %v1083_v15 = vcombine.low %v1816_v23, %v1816_v23 }
 0x1e9   : > { %1137 = vmatpush3.bf16.xpose.msra.mxu0 %v456_v25  ;;  %570 = vrot.lane.b32.xlu1 %v1818_v24, %s1527_s25  ;;  %v1824_v26 = vld [vmem:[#allocation2] ss:$0 sps:$4 sm:$0xff]   ;;  %s925_s25 = scalar_lea.sflag [#allocation5], %s1779_s7 }
 0x1ea   : > { %1148 = vmatprep.subr.bf16.mxu0 %v1524_v0  ;;  %v1827_v27 = vld [vmem:[#allocation2] ss:$0 sps:$4 sm:$0xff]  }
 0x1ed   : > { %690 = vrot.lane.b32.xlu1 %v1824_v26, %s1528_s9  ;;  %s1426_s9 = scalar_lea.vmem %s1893_s6, 128 }
 0x1ee   : > { %p1427_p12 = scmp.ne.s32.totalorder %s1893_s6, %s1426_s9 }
 0x1f0   : > { %1139 = vmatmul.mubr.msk.bf16.vlgmr.msra.gmra.mrb[4].mxu0 %vm451_vm3, %v442_v14  ;;  %p1428_p9 = pnand %p1427_p12, %p1962_p11 }
 0x1f1   : > { %810 = vrot.lane.b32.xlu1 %v1827_v27, %s1529_s5  ;;  %1150 = vmatprep.mubr.msk.bf16.mxu0 %vm1525_vm0, %v1524_v0  ;;  %s1430_s5 = sshll.u32 %s1536_s18, 4  ;;  %s1431_s5 = int_to_ptr.vmem [resolvable:$false] %s1430_s5 }
 0x1f2   : > { %p1429_p0 = pneg %p1428_p9  ;;  %p1433_p4 = scmp.lt.s32.totalorder %s1893_s6, %s1431_s5 }
 0x25b   : > { %v571_v28 = vpop.permute.xlu1 %570 }
 0x25c   : > { %v576_v29 = vsel %vm451_vm3, %v571_v28, 0 }
 0x25d   : > { %1149 = vmatpush3.bf16.xpose.msra.mxu0 %v576_v29 }
 0x25e   : > { %1160 = vmatprep.subr.bf16.mxu0 %v1524_v0 }
 0x25f   : > { %v691_v30 = vpop.permute.xlu1 %690 }
 0x260   : > { %v696_v32 = vsel %vm451_vm3, %v691_v30, 0 }
 0x263   : > { %v811_v33 = vpop.permute.xlu1 %810 }
 0x264   : > { %1151 = vmatmul.mubr.msk.bf16.vlgmr.msra.gmra.mrb[8].mxu0 %vm451_vm3, %v566_v31  ;;  %v816_v35 = vsel %vm451_vm3, %v811_v33, 0 }
 0x265   : > { %1161 = vmatpush3.bf16.xpose.msra.mxu0 %v696_v32  ;;  %1162 = vmatprep.mubr.msk.bf16.mxu0 %vm1525_vm0, %v1524_v0 }
 0x266   : > { %1172 = vmatprep.subr.bf16.mxu0 %v1524_v0 }
 0x26c   : > { %1163 = vmatmul.mubr.msk.bf16.vlgmr.msra.gmra.mrb[12].mxu0 %vm451_vm3, %v686_v34 }
 0x26d   : > { %1173 = vmatpush3.bf16.xpose.msra.mxu0 %v816_v35  ;;  %1174 = vmatprep.mubr.msk.bf16.mxu0 %vm1525_vm0, %v1524_v0 }
 0x274   : > { %1175 = vmatmul.mubr.msk.bf16.vlgmr.msra.gmra.mrb[16].mxu0 %vm451_vm3, %v806_v36 }
 0x2c3   : > { %v492_v38 = vpop.f32.mrb[4].mxu0 }
 0x2c4   : > { %v493_v39 = vadd.f32 %v1081_v37, %v492_v38  ;;  %v1140_v40 = vpop.f32.mrb[5].mxu0 }
 0x2c5   : > { %v495_v41 = vpop.f32.mrb[6].mxu0 }
 0x2c6   : > { %v1141_v42 = vpop.f32.mrb[7].mxu0  ;;  %v498_v43 = vsel %vm451_vm3, %v493_v39, -inf }
 0x2c7   : > { %499 = vmax.xlane.f32.xlu1 %v498_v43 }
 0x337   : > { %v612_v44 = vpop.f32.mrb[8].mxu0 }
 0x338   : > { %v613_v45 = vadd.f32 %v1081_v37, %v612_v44  ;;  %v1152_v46 = vpop.f32.mrb[9].mxu0 }
 0x339   : > { %v615_v47 = vpop.f32.mrb[10].mxu0 }
 0x33a   : > { %v1153_v48 = vpop.f32.mrb[11].mxu0  ;;  %v618_v49 = vsel %vm451_vm3, %v613_v45, -inf }
 0x33b   : > { %619 = vmax.xlane.f32.xlu0 %v618_v49 }
 0x33f   : > { %v732_v50 = vpop.f32.mrb[12].mxu0 }
 0x340   : > { %v733_v51 = vadd.f32 %v1081_v37, %v732_v50  ;;  %v1164_v52 = vpop.f32.mrb[13].mxu0 }
 0x341   : > { %v735_v53 = vpop.f32.mrb[14].mxu0 }
 0x342   : > { %v1165_v54 = vpop.f32.mrb[15].mxu0  ;;  %v738_v55 = vsel %vm451_vm3, %v733_v51, -inf }
 0x343   : > { %739 = vmax.xlane.f32.xlu0 %v738_v55 }
 0x347   : > { %v852_v56 = vpop.f32.mrb[16].mxu0 }
 0x348   : > { %v853_v57 = vadd.f32 %v1081_v37, %v852_v56  ;;  %v1176_v58 = vpop.f32.mrb[17].mxu0 }
 0x349   : > { %v855_v59 = vpop.f32.mrb[18].mxu0 }
 0x34a   : > { %v1177_v60 = vpop.f32.mrb[19].mxu0  ;;  %v858_v61 = vsel %vm451_vm3, %v853_v57, -inf }
 0x34b   : > { %859 = vmax.xlane.f32.xlu1 %v858_v61 }
 0x354   : > { %v500_v62 = vpop.xlane.xlu1 %499 }
 0x355   : > { %v501_v63 = vsub.f32 %v493_v39, %v500_v62 }
 0x357   : > { %v502_v1 = vmul.f32 1.442695, %v501_v63 }
 0x359   : > { %1294 = vpow2.f32 %v502_v1 }
 0x363   : > { %v1295_v2 = vpop.eup %1294 }
 0x364   : > { %v504_v3 = vsel %vm451_vm3, %v1295_v2, 0.0 }
 0x365   : > { %505 = vadd.xlane.f32.xlu0 %v504_v3 }
 0x3c8   : > { %v620_v4 = vpop.xlane.xlu0 %619 }
 0x3c9   : > { %v621_v5 = vsub.f32 %v613_v45, %v620_v4 }
 0x3cb   : > { %v622_v6 = vmul.f32 1.442695, %v621_v5 }
 0x3cd   : > { %1296 = vpow2.f32 %v622_v6 }
 0x3d0   : > { %v740_v7 = vpop.xlane.xlu0 %739 }
 0x3d1   : > { %v741_v8 = vsub.f32 %v733_v51, %v740_v7 }
 0x3d3   : > { %v742_v9 = vmul.f32 1.442695, %v741_v8 }
 0x3d5   : > { %1298 = vpow2.f32 %v742_v9 }
 0x3d7   : > { %v1297_v10 = vpop.eup %1296 }
 0x3d8   : > { %v624_v11 = vsel %vm451_vm3, %v1297_v10, 0.0  ;;  %v860_v14 = vpop.xlane.xlu1 %859 }
 0x3d9   : > { %625 = vadd.xlane.f32.xlu1 %v624_v11  ;;  %v861_v16 = vsub.f32 %v853_v57, %v860_v14 }
 0x3db   : > { %v862_v17 = vmul.f32 1.442695, %v861_v16 }
 0x3dd   : > { %1300 = vpow2.f32 %v862_v17 }
 0x3df   : > { %v1299_v12 = vpop.eup %1298 }
 0x3e0   : > { %v744_v13 = vsel %vm451_vm3, %v1299_v12, 0.0 }
 0x3e1   : > { %745 = vadd.xlane.f32.xlu0 %v744_v13 }
 0x3e7   : > { %v1301_v18 = vpop.eup %1300 }
 0x3e8   : > { %v864_v19 = vsel %vm451_vm3, %v1301_v18, 0.0 }
 0x3ea   : > { %630 = vrot.lane.b32.xlu1 %v1818_v24, %s1530_s12  ;;  %s1432_s12 = scalar_lea.vmem %s1431_s5, 256 }
 0x3eb   : > { %p1434_p13 = scmp.lt.s32.totalorder %s1432_s12, %s1426_s9 }
 0x3ed   : > { %p1435_p6 = por %p1434_p13, %p1433_p4 }
 0x3ef   : > { %p1436_p7 = pnand %p1435_p6, %p1429_p0 }
 0x3f2   : > { %v506_v20 = vpop.xlane.xlu0 %505 }
 0x3f3   : > { %1302 = vrcp.f32 %v506_v20 }
 0x3f7   : > { %513 = vrot.lane.b32.xlu0 %v1083_v15, %s1526_s23  ;;  %s1891_s23 = scalar_lea.hbm %s1945_s4, %s1095_s21 }
 0x3fb   : > { %870 = vrot.lane.b32.xlu0 %v1827_v27, %s1531_s11 }
 0x3fd   : > { %v1303_v22 = vpop.eup %1302 }
 0x3fe   : > { %v508_v24 = vmul.f32 %v1303_v22, %v1295_v2 }
 0x400   : > { %v509_v29 = vpack.c.bf16 %v508_v24, %v508_v24 }
 0x40e   : > { %865 = vadd.xlane.f32.xlu1 %v864_v19 }
 0x41f   : > { %750 = vrot.lane.b32.xlu1 %v1824_v26, %s1532_s8 }
 0x466   : > { %v626_v21 = vpop.xlane.xlu1 %625 }
 0x467   : > { %1304 = vrcp.f32 %v626_v21 }
 0x46a   : > { %v631_v28 = vpop.permute.xlu1 %630 }
 0x46b   : > { %v636_v31 = vsel %vm518_vm4, %v631_v28, 0 }
 0x46e   : > { %v746_v23 = vpop.xlane.xlu0 %745 }
 0x46f   : > { %1306 = vrcp.f32 %v746_v23 }
 0x471   : > { %v1305_v30 = vpop.eup %1304 }
 0x472   : > { %v514_v25 = vpop.permute.xlu0 %513  ;;  %v628_v26 = vmul.f32 %v1305_v30, %v1297_v10 }
 0x473   : > { %v520_v27 = vsel %vm518_vm4, %v514_v25, 0 }
 0x474   : > { %1143 = vmatpush3.bf16.msra.mxu1 %v520_v27  ;;  %v629_v32 = vpack.c.bf16 %v628_v26, %v628_v26 }
 0x475   : > { %1154 = vmatprep.subr.bf16.mxu1 %v1524_v0 }
 0x476   : > { %v871_v38 = vpop.permute.xlu0 %870 }
 0x477   : > { %1145 = vmatmul.mubr.msk.bf16.vlgmr.msra.gmra.mrb[4].mxu1 %vm451_vm3, %v509_v29  ;;  %v876_v40 = vsel %vm518_vm4, %v871_v38, 0 }
 0x478   : > { %1155 = vmatpush3.bf16.msra.mxu1 %v636_v31  ;;  %1156 = vmatprep.mubr.msk.bf16.mxu1 %vm1525_vm0, %v1524_v0 }
 0x479   : > { %1166 = vmatprep.subr.bf16.mxu1 %v1524_v0  ;;  %v1307_v33 = vpop.eup %1306 }
 0x47a   : > { %v748_v35 = vmul.f32 %v1307_v33, %v1299_v12 }
 0x47c   : > { %v749_v39 = vpack.c.bf16 %v748_v35, %v748_v35 }
 0x47f   : > { %1157 = vmatmul.mubr.msk.bf16.vlgmr.msra.gmra.mrb[8].mxu1 %vm451_vm3, %v629_v32 }
 0x480   : > { %1168 = vmatprep.mubr.msk.bf16.mxu1 %vm1525_vm0, %v1524_v0 }
 0x49b   : > { %v866_v34 = vpop.xlane.xlu1 %865 }
 0x49c   : > { %1308 = vrcp.f32 %v866_v34 }
 0x49f   : > { %v751_v36 = vpop.permute.xlu1 %750 }
 0x4a0   : > { %v756_v37 = vsel %vm518_vm4, %v751_v36, 0 }
 0x4a1   : > { %1167 = vmatpush3.bf16.msra.mxu1 %v756_v37 }
 0x4a2   : > { %1178 = vmatprep.subr.bf16.mxu1 %v1524_v0 }
 0x4a4   : > { %1169 = vmatmul.mubr.msk.bf16.vlgmr.msra.gmra.mrb[12].mxu1 %vm451_vm3, %v749_v39 }
 0x4a5   : > { %1179 = vmatpush3.bf16.msra.mxu1 %v876_v40  ;;  %1180 = vmatprep.mubr.msk.bf16.mxu1 %vm1525_vm0, %v1524_v0 }
 0x4a6   : > { %v1309_v41 = vpop.eup %1308 }
 0x4a7   : > { %v868_v42 = vmul.f32 %v1309_v41, %v1301_v18 }
 0x4a9   : > { %v869_v43 = vpack.c.bf16 %v868_v42, %v868_v42 }
 0x4ac   : > { %1181 = vmatmul.mubr.msk.bf16.vlgmr.msra.gmra.mrb[16].mxu1 %vm451_vm3, %v869_v43 }
 0x54a   : > { %v556_v44 = vpop.f32.mrb[4].mxu1 }
 0x54b   : > { %562 = vst.msk [vmem:[%s1880_s22] sm:$0xff] %vm451_vm3, %v556_v44  ;;  %v1146_v45 = vpop.f32.mrb[5].mxu1 }
 0x54c   : > { %v559_v46 = vpop.f32.mrb[6].mxu1 }
 0x54d   : > { %v1147_v47 = vpop.f32.mrb[7].mxu1 }
 0x552   : > { %v672_v48 = vpop.f32.mrb[8].mxu1 }
 0x553   : > { %679 = vrot.lane.b32.xlu1 %v672_v48, %s1533_s24  ;;  %v1158_v49 = vpop.f32.mrb[9].mxu1 }
 0x554   : > { %v675_v0 = vpop.f32.mrb[10].mxu1 }
 0x555   : > { %v1159_v50 = vpop.f32.mrb[11].mxu1 }
 0x577   : > { %v792_v51 = vpop.f32.mrb[12].mxu1 }
 0x578   : > { %799 = vrot.lane.b32.xlu0 %v792_v51, %s1534_s13  ;;  %v1170_v52 = vpop.f32.mrb[13].mxu1 }
 0x579   : > { %v795_v53 = vpop.f32.mrb[14].mxu1 }
 0x57a   : > { %v1171_v54 = vpop.f32.mrb[15].mxu1 }
 0x57f   : > { %v912_v55 = vpop.f32.mrb[16].mxu1 }
 0x580   : > { %919 = vrot.lane.b32.xlu1 %v912_v55, %s1535_s29  ;;  %v1182_v56 = vpop.f32.mrb[17].mxu1 }
 0x581   : > { %v915_v57 = vpop.f32.mrb[18].mxu1 }
 0x582   : > { %v1183_v58 = vpop.f32.mrb[19].mxu1 }
 0x5c5   : > { %v680_v59 = vpop.permute.xlu1 %679 }
 0x5c6   : > { %683 = vst.msk [vmem:[%s1880_s22] sm:$0xff] %vm682_vm5, %v680_v59 }
 0x5ea   : > { %v800_v60 = vpop.permute.xlu0 %799 }
 0x5eb   : > { %803 = vst.msk [vmem:[%s1880_s22] sm:$0xff] %vm802_vm6, %v800_v60 }
 0x5f2   : > { %v920_v61 = vpop.permute.xlu1 %919 }
 0x5f3   : > { %923 = vst.msk [vmem:[%s1880_s22] sm:$0xff] %vm922_vm7, %v920_v61 }
 0x5f4   : > { %1439 = shalt.err (!%p1436_p7)
}
 0x5f5   : > { %s1440_s7 = scalar_lea.hbm %s1891_s23, 128  ;;  %s1444_s22 = scalar_lea.hbm %s1945_s4, 256 }
 0x5f6   : > { %p1441_p1 = scmp.ne.s32.totalorder %s1891_s23, %s1440_s7  ;;  %p1445_p10 = scmp.lt.u32.totalorder %s1891_s23, %s1945_s4 }
 0x5f7   : > { %p1446_p8 = scmp.lt.u32.totalorder %s1444_s22, %s1440_s7  ;;  %p1448_p12 = scmp.lt.u32.totalorder %s1440_s7, %s1891_s23 }
 0x5f8   : > { %p1442_p3 = pnand %p1441_p1, %p1962_p11 }
 0x5f9   : > { %p1447_p2 = por %p1446_p8, %p1445_p10 }
 0x5fa   : > { %p1443_p5 = pneg %p1442_p3 }
 0x5fb   : > { %p1449_p9 = por %p1448_p12, %p1447_p2 }
 0x5fd   : > { %p1450_p0 = pnand %p1449_p9, %p1443_p5 }
 0x5ff   : > { %1453 = shalt.err (!%p1450_p0)
}
 0x600   : > { %1196 = dma.vmem_to_hbm [thread:$0]  (%p1962_p11), %s1893_s6, 128, %s1891_s23, %s925_s25  }
 0x601 PF: > { %s951_s29 = sand.u32 1, %s1496_s15   ;;  %p1963_p4 = scmp.ne.s32.totalorder %s1954_s26, 0 }
 0x602   : > { %p1964_p13 = scmp.ge.s32.totalorder %s1516_s20, 2  ;;  %s952_s21 = scalar_lea.sflag [#allocation5], %s951_s29 }
 0x604   : > { %p1213_p6 = pnand %p1964_p13, %p1963_p4 }
 0x606   : > { %1491 = dma.done.wait (!%p1213_p6), %s952_s21, 128  }
 0x607   : > { %1493 = vsyncadd (!%p1213_p6), %s952_s21, 4294967168  ;;  %s24_s20 = sadd.s32 1, %s1516_s20   ;;  %s1965_s15 = smov %s1500_s16 }
 0x608   : > { %p21_p7 = scmp.ge.s32.totalorder %s24_s20, 4   ;;  %s1966_s16 = smov %s1504_s17 }
 0x609   : > { %s1967_s17 = smov %s1708_s10  ;;  %s1968_s18 = smov %s1512_s19 }
 0x60a   : > { %s1969_s19 = smov %s1971_s28  ;;  %23 = sbr.rel (!%p21_p7) target bundleno = 9 (0x9), region = 107 }
 0x611   :  { %957 = vsyncpa [#allocation4], 1 }
 0x612   :  { %959 = vsyncpa [#allocation4 + $0x1], 1 }
 0x613   :  { %960 = vsyncpa [#allocation7], 1 }
 0x614   :  { %961 = vsyncpa [#allocation10], 1 }
 0x615   :  { %963 = vsyncpa [#allocation10 + $0x1], 1 }
 0x616   :  { %964 = vsyncpa [#allocation5], 1 }
 0x617   :  { %966 = vsyncpa [#allocation5 + $0x1], 1 }

</bundles_post_ra>
